<compile_context>
chip_gen: v7x
topology: tpu7x:2x2x1
jax: 0.10.0
libtpu: 0.0.40
codegen_flags: <defaults>
</compile_context>

<pallas_src>
import functools
import math

import jax
import jax.numpy as jnp
from jax.experimental import pallas as pl
from jax.experimental.pallas import tpu as pltpu


def _round_up(x, m):
    return ((x + m - 1) // m) * m


def _cdiv(a, b):
    return -(-a // b)


def _gelu_exact(x):
    # torch nn.GELU() default = exact erf formulation
    return x * 0.5 * (1.0 + jax.lax.erf(x * (1.0 / math.sqrt(2.0))))


def _clip3d_kernel(x_ref,
                   w1_ref, b1_ref, w2_ref, b2_ref,
                   w3_ref, b3_ref, w4_ref, b4_ref,
                   o_ref,
                   *, matmul_dtype, approximate_gelu):
    if approximate_gelu:
        gelu = lambda v: jax.nn.gelu(v, approximate=True)   # tanh -> EUP slot
    else:
        gelu = _gelu_exact                                  # matches torch default

    def mm(a, w_ref):
        # bf16 (or f32) MXU inputs, always f32 accumulation. Weights are
        # pre-cast in the wrapper; a.astype is a no-op on the hot path.
        return jnp.dot(a.astype(matmul_dtype), w_ref[...],
                       preferred_element_type=jnp.float32)

    x = x_ref[...]   # already in matmul_dtype (cast once in the wrapper)

    # ---- encoder: Linear(D, 2D) -> GELU -> Linear(2D, Dout) -> LayerNorm ----
    h = gelu(mm(x, w1_ref) + b1_ref[...]).astype(matmul_dtype)
    f = mm(h, w2_ref) + b2_ref[...]

    # LayerNorm, eps=1e-5. Affine (gamma, beta) is folded into w3/b3 in the
    # wrapper. One-pass stats: var = E[f^2] - mu^2 (clamped against rounding).
    mu = jnp.mean(f, axis=-1, keepdims=True)
    var = jnp.maximum(jnp.mean(f * f, axis=-1, keepdims=True) - mu * mu, 0.0)
    inv = jax.lax.rsqrt(var + 1e-5)
    f_n = ((f - mu) * inv).astype(matmul_dtype)

    # ---- spatial_proj: Linear(Dout, Dout) -> GELU -> Linear(Dout, Dout) ----
    s = gelu(mm(f_n, w3_ref) + b3_ref[...]).astype(matmul_dtype)
    out = mm(s, w4_ref) + b4_ref[...]

    o_ref[...] = out.astype(o_ref.dtype)


def init_clip3d_params(key, embed_dim=768, output_dim=768, dtype=jnp.float32):
    """Deterministic init matching the module's _init_weights:
    Linear weights ~ N(0, 0.02), biases = 0, LayerNorm gamma=1 / beta=0.
    Weights stored as (in, out) (transpose of torch's (out, in))."""
    ks = jax.random.split(key, 4)
    std = 0.02
    return {
        "w1": std * jax.random.normal(ks[0], (embed_dim, 2 * embed_dim), dtype),
        "b1": jnp.zeros((1, 2 * embed_dim), dtype),
        "w2": std * jax.random.normal(ks[1], (2 * embed_dim, output_dim), dtype),
        "b2": jnp.zeros((1, output_dim), dtype),
        "ln_g": jnp.ones((1, output_dim), dtype),
        "ln_b": jnp.zeros((1, output_dim), dtype),
        "w3": std * jax.random.normal(ks[2], (output_dim, output_dim), dtype),
        "b3": jnp.zeros((1, output_dim), dtype),
        "w4": std * jax.random.normal(ks[3], (output_dim, output_dim), dtype),
        "b4": jnp.zeros((1, output_dim), dtype),
    }


def clip3d_embedder(embeddings, params, *, row_tile=512,
                    use_bf16_matmul=True, approximate_gelu=True,
                    min_grid_steps=2):
    """embeddings: [..., embed_dim]  ->  [..., output_dim]

    row_tile: rows per grid step. 512 is a good default on v6e/v7x; use
    128-256 on v5e (slower 4x128^2 MXU is already the bottleneck there).
    min_grid_steps: keep >= 2 so the "parallel" grid axis can shard across both
    v7x TensorCores even when M is small.

    Default path uses bf16 MXU inputs with f32 accumulation and tanh GELU;
    pass use_bf16_matmul=False, approximate_gelu=False for exact torch
    (f32, erf-GELU) semantics.
    """
    orig_shape = embeddings.shape
    D = orig_shape[-1]
    Dout = params["w2"].shape[1]

    x = embeddings.reshape(-1, D)
    M = x.shape[0]

    matmul_dtype = jnp.bfloat16 if use_bf16_matmul else jnp.float32
    w_dtype = jnp.bfloat16 if use_bf16_matmul else params["w1"].dtype
    if use_bf16_matmul:
        # Cast once here: x only feeds the first matmul, so this is numerically
        # identical to casting in-kernel, but halves input HBM/VMEM traffic and
        # removes a (tm, D) VALU cast per grid step.
        x = x.astype(jnp.bfloat16)

    # Row tile: multiple of 8 (sublane), capped so we get >= min_grid_steps
    # grid steps. The last block may be partial; Pallas masks its store and the
    # garbage rows it reads are row-independent, so they never contaminate
    # valid output rows.
    tm = min(_round_up(row_tile, 8), _round_up(_cdiv(M, max(min_grid_steps, 1)), 8))
    tm = max(tm, 8)
    grid = _cdiv(M, tm)

    # Fold LayerNorm affine into the first spatial_proj linear (exact algebra):
    #   (f_n * g + beta) @ W3 + b3 == f_n @ (g[:,None] * W3) + (beta @ W3 + b3)
    f32 = jnp.float32
    w3_f32 = params["w3"].astype(f32)
    w3_folded = params["ln_g"].astype(f32).reshape(-1, 1) * w3_f32
    b3_folded = params["b3"].astype(f32) + params["ln_b"].astype(f32).reshape(1, -1) @ w3_f32

    w_args = (params["w1"].astype(w_dtype), params["b1"].astype(f32),
              params["w2"].astype(w_dtype), params["b2"].astype(f32),
              w3_folded.astype(w_dtype), b3_folded.astype(f32),
              params["w4"].astype(w_dtype), params["b4"].astype(f32))

    def weight_spec(arr):
        # Constant index_map -> the block never changes; single-buffer it so
        # weights are not double-buffered in VMEM.
        return pl.BlockSpec(arr.shape, lambda i: (0, 0),
                            pipeline_mode=pl.Buffered(1))

    flops = 2 * M * (D * 2 * D + 2 * D * Dout + 2 * Dout * Dout)
    transcendentals = M * (2 * D + Dout)        # two GELUs
    bytes_accessed = (sum(int(w.size) * w.dtype.itemsize for w in w_args)
                      + M * D * x.dtype.itemsize
                      + M * Dout * jnp.dtype(embeddings.dtype).itemsize)

    kernel = functools.partial(_clip3d_kernel,
                               matmul_dtype=matmul_dtype,
                               approximate_gelu=approximate_gelu)

    out = pl.pallas_call(
        kernel,
        out_shape=jax.ShapeDtypeStruct((M, Dout), embeddings.dtype),
        grid_spec=pltpu.PrefetchScalarGridSpec(
            num_scalar_prefetch=0,
            grid=(grid,),
            in_specs=[pl.BlockSpec((tm, D), lambda i: (i, 0))]
                     + [weight_spec(w) for w in w_args],
            out_specs=pl.BlockSpec((tm, Dout), lambda i: (i, 0)),
        ),
        compiler_params=pltpu.CompilerParams(
            dimension_semantics=("parallel",),
            # ~7 MiB bf16 weights + double-buffered row tiles + intermediates
            # fits easily; 48 MiB leaves headroom on v7x (64 MiB physical VMEM).
            vmem_limit_bytes=48 * 1024 * 1024,
        ),
        cost_estimate=pl.CostEstimate(
            flops=flops,
            transcendentals=transcendentals,
            bytes_accessed=bytes_accessed,
        ),
    )(x, *w_args)

    return out.reshape(orig_shape[:-1] + (Dout,))


def _reference(embeddings, p, *, matmul_dtype=jnp.float32, approximate_gelu=False):
    """Pure-JAX reference mirroring the torch module (un-fused LayerNorm,
    optionally with the kernel's bf16-input / f32-accumulate matmul policy)."""
    gelu = (lambda v: jax.nn.gelu(v, approximate=True)) if approximate_gelu else _gelu_exact

    def mm(a, w):
        return jnp.dot(a.astype(matmul_dtype), w.astype(matmul_dtype),
                       preferred_element_type=jnp.float32)

    x = embeddings.astype(jnp.float32)
    h = gelu(mm(x, p["w1"]) + p["b1"])
    f = mm(h, p["w2"]) + p["b2"]
    mu = jnp.mean(f, axis=-1, keepdims=True)
    var = jnp.mean(jnp.square(f - mu), axis=-1, keepdims=True)
    f = (f - mu) * jax.lax.rsqrt(var + 1e-5) * p["ln_g"] + p["ln_b"]
    s = gelu(mm(f, p["w3"]) + p["b3"])
    return (mm(s, p["w4"]) + p["b4"]).astype(embeddings.dtype)


if __name__ == "__main__":
    # Small shapes consistent with the module: [batch, seq, embed_dim]
    batch, seq, embed_dim, output_dim = 2, 8, 32, 32

    key = jax.random.PRNGKey(0)
    k_x, k_p = jax.random.split(key)

    x = jax.random.normal(k_x, (batch, seq, embed_dim), jnp.float32)
    params = init_clip3d_params(k_p, embed_dim=embed_dim, output_dim=output_dim)

    # Default (performance) path: bf16 MXU inputs, f32 accumulation, tanh GELU.
    y = jax.block_until_ready(clip3d_embedder(x, params))
    y_ref_fast = jax.block_until_ready(
        _reference(x, params, matmul_dtype=jnp.bfloat16, approximate_gelu=True))
    assert y.shape == (batch, seq, output_dim)
    assert jnp.allclose(y, y_ref_fast, atol=2e-3, rtol=2e-3), \
        "mismatch vs bf16/tanh-GELU reference"

    # Exact-semantics path (f32 matmuls, exact erf GELU) vs the torch-equivalent
    # f32 reference.
    y_f32 = jax.block_until_ready(
        clip3d_embedder(x, params, use_bf16_matmul=False, approximate_gelu=False))
    y_ref_f32 = jax.block_until_ready(_reference(x, params))
    assert jnp.allclose(y_f32, y_ref_f32, atol=1e-4, rtol=1e-4), \
        "mismatch vs pure-JAX f32 reference"

    print("KERNEL_OK")
</pallas_src>

<mosaic_0001>
module attributes {stable_mosaic.version = 11 : i64} {
  func.func @_clip3d_kernel(%arg0: i32, %arg1: memref<8x32xbf16, #tpu.memory_space<vmem>>, %arg2: memref<32x64xbf16, #tpu.memory_space<vmem>>, %arg3: memref<1x64xf32, #tpu.memory_space<vmem>>, %arg4: memref<64x32xbf16, #tpu.memory_space<vmem>>, %arg5: memref<1x32xf32, #tpu.memory_space<vmem>>, %arg6: memref<32x32xbf16, #tpu.memory_space<vmem>>, %arg7: memref<1x32xf32, #tpu.memory_space<vmem>>, %arg8: memref<32x32xbf16, #tpu.memory_space<vmem>>, %arg9: memref<1x32xf32, #tpu.memory_space<vmem>>, %arg10: memref<8x32xf32, #tpu.memory_space<vmem>>) attributes {dimension_semantics = [#tpu.dimension_semantics<parallel>], iteration_bounds = array<i64: 2>, scalar_prefetch = 0 : i64, scratch_operands = 0 : i64, tpu.core_type = #tpu.core_type<tc>, window_params = [{transform_indices = @transform_0, window_bounds = array<i64: 8, 32>}, {pipeline_mode = #tpu.pipeline_mode<synchronous>, transform_indices = @transform_1, window_bounds = array<i64: 32, 64>}, {pipeline_mode = #tpu.pipeline_mode<synchronous>, transform_indices = @transform_2, window_bounds = array<i64: 1, 64>}, {pipeline_mode = #tpu.pipeline_mode<synchronous>, transform_indices = @transform_3, window_bounds = array<i64: 64, 32>}, {pipeline_mode = #tpu.pipeline_mode<synchronous>, transform_indices = @transform_4, window_bounds = array<i64: 1, 32>}, {pipeline_mode = #tpu.pipeline_mode<synchronous>, transform_indices = @transform_5, window_bounds = array<i64: 32, 32>}, {pipeline_mode = #tpu.pipeline_mode<synchronous>, transform_indices = @transform_6, window_bounds = array<i64: 1, 32>}, {pipeline_mode = #tpu.pipeline_mode<synchronous>, transform_indices = @transform_7, window_bounds = array<i64: 32, 32>}, {pipeline_mode = #tpu.pipeline_mode<synchronous>, transform_indices = @transform_8, window_bounds = array<i64: 1, 32>}, {transform_indices = @transform_9, window_bounds = array<i64: 8, 32>}]} {
    %c0 = arith.constant 0 : index
    %c0_0 = arith.constant 0 : index
    %0 = vector.load %arg1[%c0, %c0_0] : memref<8x32xbf16, #tpu.memory_space<vmem>>, vector<8x32xbf16>
    %c0_1 = arith.constant 0 : index
    %c0_2 = arith.constant 0 : index
    %1 = vector.load %arg2[%c0_1, %c0_2] : memref<32x64xbf16, #tpu.memory_space<vmem>>, vector<32x64xbf16>
    %cst = arith.constant dense<0.000000e+00> : vector<8x64xf32>
    %2 = tpu.matmul %0, %1, %cst {dimension_numbers = #tpu.dot_dimension_numbers<[1], [0], [0], [1], [0, 0, 1, 1], [], []>} : vector<8x32xbf16>, vector<32x64xbf16>, vector<8x64xf32> -> vector<8x64xf32>
    %c0_3 = arith.constant 0 : index
    %c0_4 = arith.constant 0 : index
    %3 = vector.load %arg3[%c0_3, %c0_4] : memref<1x64xf32, #tpu.memory_space<vmem>>, vector<1x64xf32>
    %4 = vector.broadcast %3 : vector<1x64xf32> to vector<8x64xf32>
    %5 = arith.addf %2, %4 : vector<8x64xf32>
    %6 = arith.mulf %5, %5 : vector<8x64xf32>
    %7 = arith.mulf %5, %6 : vector<8x64xf32>
    %cst_5 = arith.constant 4.471500e-02 : f32
    %8 = vector.broadcast %cst_5 : f32 to vector<8x64xf32>
    %9 = arith.mulf %8, %7 : vector<8x64xf32>
    %10 = arith.addf %5, %9 : vector<8x64xf32>
    %cst_6 = arith.constant 0.797884583 : f32
    %11 = vector.broadcast %cst_6 : f32 to vector<8x64xf32>
    %12 = arith.mulf %11, %10 : vector<8x64xf32>
    %13 = math.tanh %12 : vector<8x64xf32>
    %cst_7 = arith.constant 1.000000e+00 : f32
    %14 = vector.broadcast %cst_7 : f32 to vector<8x64xf32>
    %15 = arith.addf %14, %13 : vector<8x64xf32>
    %cst_8 = arith.constant 5.000000e-01 : f32
    %16 = vector.broadcast %cst_8 : f32 to vector<8x64xf32>
    %17 = arith.mulf %16, %15 : vector<8x64xf32>
    %18 = arith.mulf %5, %17 : vector<8x64xf32>
    %19 = arith.truncf %18 : vector<8x64xf32> to vector<8x64xbf16>
    %c0_9 = arith.constant 0 : index
    %c0_10 = arith.constant 0 : index
    %20 = vector.load %arg4[%c0_9, %c0_10] : memref<64x32xbf16, #tpu.memory_space<vmem>>, vector<64x32xbf16>
    %cst_11 = arith.constant dense<0.000000e+00> : vector<8x32xf32>
    %21 = tpu.matmul %19, %20, %cst_11 {dimension_numbers = #tpu.dot_dimension_numbers<[1], [0], [0], [1], [0, 0, 1, 1], [], []>} : vector<8x64xbf16>, vector<64x32xbf16>, vector<8x32xf32> -> vector<8x32xf32>
    %c0_12 = arith.constant 0 : index
    %c0_13 = arith.constant 0 : index
    %22 = vector.load %arg5[%c0_12, %c0_13] : memref<1x32xf32, #tpu.memory_space<vmem>>, vector<1x32xf32>
    %23 = vector.broadcast %22 : vector<1x32xf32> to vector<8x32xf32>
    %24 = arith.addf %21, %23 : vector<8x32xf32>
    %cst_14 = arith.constant dense<0.000000e+00> : vector<8xf32>
    %25 = vector.multi_reduction <add>, %24, %cst_14 [1] : vector<8x32xf32> to vector<8xf32>
    %26 = vector.shape_cast %25 : vector<8xf32> to vector<8x1xf32>
    %cst_15 = arith.constant 3.200000e+01 : f32
    %27 = vector.broadcast %cst_15 : f32 to vector<8x1xf32>
    %28 = arith.divf %26, %27 : vector<8x1xf32>
    %29 = arith.mulf %24, %24 : vector<8x32xf32>
    %cst_16 = arith.constant dense<0.000000e+00> : vector<8xf32>
    %30 = vector.multi_reduction <add>, %29, %cst_16 [1] : vector<8x32xf32> to vector<8xf32>
    %31 = vector.shape_cast %30 : vector<8xf32> to vector<8x1xf32>
    %cst_17 = arith.constant 3.200000e+01 : f32
    %32 = vector.broadcast %cst_17 : f32 to vector<8x1xf32>
    %33 = arith.divf %31, %32 : vector<8x1xf32>
    %34 = arith.mulf %28, %28 : vector<8x1xf32>
    %35 = arith.subf %33, %34 : vector<8x1xf32>
    %cst_18 = arith.constant 0.000000e+00 : f32
    %36 = vector.broadcast %cst_18 : f32 to vector<8x1xf32>
    %37 = arith.maximumf %35, %36 : vector<8x1xf32>
    %cst_19 = arith.constant 9.99999974E-6 : f32
    %38 = vector.broadcast %cst_19 : f32 to vector<8x1xf32>
    %39 = arith.addf %37, %38 : vector<8x1xf32>
    %40 = math.rsqrt %39 : vector<8x1xf32>
    %41 = vector.broadcast %28 : vector<8x1xf32> to vector<8x32xf32>
    %42 = arith.subf %24, %41 : vector<8x32xf32>
    %43 = vector.broadcast %40 : vector<8x1xf32> to vector<8x32xf32>
    %44 = arith.mulf %42, %43 : vector<8x32xf32>
    %45 = arith.truncf %44 : vector<8x32xf32> to vector<8x32xbf16>
    %c0_20 = arith.constant 0 : index
    %c0_21 = arith.constant 0 : index
    %46 = vector.load %arg6[%c0_20, %c0_21] : memref<32x32xbf16, #tpu.memory_space<vmem>>, vector<32x32xbf16>
    %cst_22 = arith.constant dense<0.000000e+00> : vector<8x32xf32>
    %47 = tpu.matmul %45, %46, %cst_22 {dimension_numbers = #tpu.dot_dimension_numbers<[1], [0], [0], [1], [0, 0, 1, 1], [], []>} : vector<8x32xbf16>, vector<32x32xbf16>, vector<8x32xf32> -> vector<8x32xf32>
    %c0_23 = arith.constant 0 : index
    %c0_24 = arith.constant 0 : index
    %48 = vector.load %arg7[%c0_23, %c0_24] : memref<1x32xf32, #tpu.memory_space<vmem>>, vector<1x32xf32>
    %49 = vector.broadcast %48 : vector<1x32xf32> to vector<8x32xf32>
    %50 = arith.addf %47, %49 : vector<8x32xf32>
    %51 = arith.mulf %50, %50 : vector<8x32xf32>
    %52 = arith.mulf %50, %51 : vector<8x32xf32>
    %cst_25 = arith.constant 4.471500e-02 : f32
    %53 = vector.broadcast %cst_25 : f32 to vector<8x32xf32>
    %54 = arith.mulf %53, %52 : vector<8x32xf32>
    %55 = arith.addf %50, %54 : vector<8x32xf32>
    %cst_26 = arith.constant 0.797884583 : f32
    %56 = vector.broadcast %cst_26 : f32 to vector<8x32xf32>
    %57 = arith.mulf %56, %55 : vector<8x32xf32>
    %58 = math.tanh %57 : vector<8x32xf32>
    %cst_27 = arith.constant 1.000000e+00 : f32
    %59 = vector.broadcast %cst_27 : f32 to vector<8x32xf32>
    %60 = arith.addf %59, %58 : vector<8x32xf32>
    %cst_28 = arith.constant 5.000000e-01 : f32
    %61 = vector.broadcast %cst_28 : f32 to vector<8x32xf32>
    %62 = arith.mulf %61, %60 : vector<8x32xf32>
    %63 = arith.mulf %50, %62 : vector<8x32xf32>
    %64 = arith.truncf %63 : vector<8x32xf32> to vector<8x32xbf16>
    %c0_29 = arith.constant 0 : index
    %c0_30 = arith.constant 0 : index
    %65 = vector.load %arg8[%c0_29, %c0_30] : memref<32x32xbf16, #tpu.memory_space<vmem>>, vector<32x32xbf16>
    %cst_31 = arith.constant dense<0.000000e+00> : vector<8x32xf32>
    %66 = tpu.matmul %64, %65, %cst_31 {dimension_numbers = #tpu.dot_dimension_numbers<[1], [0], [0], [1], [0, 0, 1, 1], [], []>} : vector<8x32xbf16>, vector<32x32xbf16>, vector<8x32xf32> -> vector<8x32xf32>
    %c0_32 = arith.constant 0 : index
    %c0_33 = arith.constant 0 : index
    %67 = vector.load %arg9[%c0_32, %c0_33] : memref<1x32xf32, #tpu.memory_space<vmem>>, vector<1x32xf32>
    %68 = vector.broadcast %67 : vector<1x32xf32> to vector<8x32xf32>
    %69 = arith.addf %66, %68 : vector<8x32xf32>
    %c0_34 = arith.constant 0 : index
    %c0_35 = arith.constant 0 : index
    %70 = vector.load %arg10[%c0_34, %c0_35] : memref<8x32xf32, #tpu.memory_space<vmem>>, vector<8x32xf32>
    tpu.vector_store %arg10[%c0_34, %c0_35], %69 {strides = array<i32>} : memref<8x32xf32, #tpu.memory_space<vmem>>, vector<8x32xf32>,
    return
  }
  func.func @transform_0(%arg0: i32) -> (i32, i32) {
    %c0_i32 = arith.constant 0 : i32
    %c0_i32_0 = arith.constant 0 : i32
    return %arg0, %c0_i32 : i32, i32
  }
  func.func @transform_1(%arg0: i32) -> (i32, i32) {
    %c0_i32 = arith.constant 0 : i32
    %c0_i32_0 = arith.constant 0 : i32
    %c0_i32_1 = arith.constant 0 : i32
    return %c0_i32, %c0_i32_0 : i32, i32
  }
  func.func @transform_2(%arg0: i32) -> (i32, i32) {
    %c0_i32 = arith.constant 0 : i32
    %c0_i32_0 = arith.constant 0 : i32
    %c0_i32_1 = arith.constant 0 : i32
    return %c0_i32, %c0_i32_0 : i32, i32
  }
  func.func @transform_3(%arg0: i32) -> (i32, i32) {
    %c0_i32 = arith.constant 0 : i32
    %c0_i32_0 = arith.constant 0 : i32
    %c0_i32_1 = arith.constant 0 : i32
    return %c0_i32, %c0_i32_0 : i32, i32
  }
  func.func @transform_4(%arg0: i32) -> (i32, i32) {
    %c0_i32 = arith.constant 0 : i32
    %c0_i32_0 = arith.constant 0 : i32
    %c0_i32_1 = arith.constant 0 : i32
    return %c0_i32, %c0_i32_0 : i32, i32
  }
  func.func @transform_5(%arg0: i32) -> (i32, i32) {
    %c0_i32 = arith.constant 0 : i32
    %c0_i32_0 = arith.constant 0 : i32
    %c0_i32_1 = arith.constant 0 : i32
    return %c0_i32, %c0_i32_0 : i32, i32
  }
  func.func @transform_6(%arg0: i32) -> (i32, i32) {
    %c0_i32 = arith.constant 0 : i32
    %c0_i32_0 = arith.constant 0 : i32
    %c0_i32_1 = arith.constant 0 : i32
    return %c0_i32, %c0_i32_0 : i32, i32
  }
  func.func @transform_7(%arg0: i32) -> (i32, i32) {
    %c0_i32 = arith.constant 0 : i32
    %c0_i32_0 = arith.constant 0 : i32
    %c0_i32_1 = arith.constant 0 : i32
    return %c0_i32, %c0_i32_0 : i32, i32
  }
  func.func @transform_8(%arg0: i32) -> (i32, i32) {
    %c0_i32 = arith.constant 0 : i32
    %c0_i32_0 = arith.constant 0 : i32
    %c0_i32_1 = arith.constant 0 : i32
    return %c0_i32, %c0_i32_0 : i32, i32
  }
  func.func @transform_9(%arg0: i32) -> (i32, i32) {
    %c0_i32 = arith.constant 0 : i32
    %c0_i32_0 = arith.constant 0 : i32
    return %arg0, %c0_i32 : i32, i32
  }
}

</mosaic_0001>

<bundles_post_ra>
// kernel: tpu_custom_call.1
= control target key start
LH: loop header
LB: loop body
LE: loop exit
PB: predicated region body
PF: predicated region fallthrough
CT: control target
= control target key end

     0   :  { %14 = vsyncpa [#allocation3], 0  ;;  %s1279_s0 = inlined_call_operand.hbm [shape: bf16[16,32], index: 0, kind: input, shape index: {}]   ;;  %s1280_s1 = inlined_call_operand.vmem [shape: bf16[32,64], index: 1, kind: input, shape index: {}]   ;;  %s1281_s2 = inlined_call_operand.vmem [shape: f32[1,64], index: 2, kind: input, shape index: {}]   ;;  %s1282_s3 = inlined_call_operand.vmem [shape: bf16[64,32], index: 3, kind: input, shape index: {}]   ;;  %s1283_s4 = inlined_call_operand.vmem [shape: f32[1,32], index: 4, kind: input, shape index: {}]   ;;  %s1284_s5 = inlined_call_operand.vmem [shape: bf16[32,32], index: 5, kind: input, shape index: {}]   ;;  %s1285_s6 = inlined_call_operand.vmem [shape: f32[1,32], index: 6, kind: input, shape index: {}]   ;;  %s1286_s7 = inlined_call_operand.vmem [shape: bf16[32,32], index: 7, kind: input, shape index: {}]   ;;  %s1287_s8 = inlined_call_operand.vmem [shape: f32[1,32], index: 8, kind: input, shape index: {}]   ;;  %s1288_s9 = inlined_call_operand.hbm [shape: f32[16,32], index: 9, kind: output, shape index: {}]  }
   0x1   :  { %16 = vsyncpa [#allocation3 + $0x1], 0 }
   0x2   :  { %17 = vsyncpa [#allocation4], 0 }
   0x3   :  { %19 = vsyncpa [#allocation4 + $0x1], 0  ;;  %s1051_s30 = smov 0   ;;  %s1053_s10 = smov 0  }
   0x4   :  { %s1055_s11 = smov 0   ;;  %s1057_s12 = smov 0  }
   0x5 LB: > { %s1072_s13 = sadd.s32 4294967295, %s995_s12   ;;  %s755_s14 = sadd.s32 4294967294, %s995_s12   ;;  %s995_s12 = sphi %s1057_s12, %s1303_s12   ;;  %s991_s11 = sphi %s1055_s11, %s1302_s11   ;;  %s987_s10 = sphi %s1053_s10, %s1301_s10   ;;  %s983_s30 = sphi %s1051_s30, %s1300_s30  }
   0x6   : > { %s1076_s15 = sadd.s32 1, %s995_s12   ;;  %s32_s16 = sadd.s32 1, %s991_s11 }
   0x7   : > { %s29_s17 = ssub.s32 %s995_s12, %s1076_s15  ;;  %p39_p0 = scmp.ne.s32.totalorder %s991_s11, %s987_s10 }
   0x8   : > { %p30_p1 = scmp.eq.s32.totalorder %s29_s17, 0  ;;  %p40_p2 = scmp.eq.s32.totalorder %s995_s12, 0 }
   0x9   : > { %p45_p3 = scmp.ne.s32.totalorder %s987_s10, %s983_s30  ;;  %p46_p4 = scmp.eq.s32.totalorder %s1072_s13, 0 }
   0xa   : > { %s1088_s18 = scalar_select %p30_p1, %s991_s11, %s32_s16  }
   0xb   : > { %p1090_p5 = por %p40_p2, %p39_p0  ;;  %p1094_p6 = por %p46_p4, %p45_p3 }
   0xc   : > { %p237_p7 = scmp.eq.s32.totalorder %s1072_s13, 1  ;;  %p243_p8 = scmp.eq.s32.totalorder %s755_s14, 1 }
   0xd   : > { %p847_p10 = scmp.lt.s32.totalorder %s995_s12, 2  ;;  %s287_s23 = sand.u32 1, %s991_s11  }
   0xe   : > { %p1101_p11 = por %p237_p7, %p39_p0  ;;  %p1105_p12 = por %p243_p8, %p45_p3 }
   0xf   : > { %s759_s24 = sshll.u32 %s995_s12, 6  ;;  %s758_s25 = sshll.u32 %s287_s23, 2 }
  0x10   : > { %s1292_s21 = scalar_select %p1101_p11, 1, 0 }
  0x11   : > { %s1293_s22 = scalar_select %p1105_p12, 1, 0 }
  0x12   : > { %s1114_s28 = scalar_lea.hbm %s1279_s0, %s759_s24  ;;  %s291_s29 = scalar_lea.vmem [#allocation2], %s758_s25 }
  0x13   : > { %s298_s14 = sshll.u32 %s291_s29, 4  ;;  %p1118_p13 = pnand %p847_p10, %p1090_p5  ;;  %s1122_s14 = int_to_ptr.vmem [resolvable:$true] %s298_s14 }
  0x14   : > { %s288_s17 = scalar_lea.sflag [#allocation3], %s287_s23  ;;  %s899_s24 = scalar_lea.hbm %s1114_s28, 64 }
  0x15   : > { %p900_p2 = scmp.ne.s32.totalorder %s1114_s28, %s899_s24  ;;  %p901_p3 = pneg %p1118_p13 }
  0x16   : > { %s904_s26 = scalar_lea.hbm %s1279_s0, 128  ;;  %p905_p5 = scmp.lt.u32.totalorder %s1114_s28, %s1279_s0 }
  0x17   : > { %p902_p4 = pnand %p901_p3, %p900_p2  ;;  %p906_p8 = scmp.lt.u32.totalorder %s904_s26, %s899_s24 }
  0x18   : > { %p908_p9 = scmp.lt.u32.totalorder %s899_s24, %s1114_s28 }
  0x19   : > { %p903_p7 = pneg %p902_p4  ;;  %p907_p10 = por %p906_p8, %p905_p5 }
  0x1b   : > { %p909_p0 = por %p908_p9, %p907_p10 }
  0x1d   : > { %p910_p1 = pnand %p909_p0, %p903_p7 }
  0x1f   : > { %913 = shalt.err (!%p910_p1)
}
  0x20   : > { %s914_s23 = scalar_lea.vmem %s1122_s14, 64  ;;  %s997_s19 = smov [#allocation2]  }
  0x21   : > { %p915_p2 = scmp.ne.s32.totalorder %s1122_s14, %s914_s23  ;;  %s919_s25 = sshll.u32 %s997_s19, 4  ;;  %s920_s25 = int_to_ptr.vmem [resolvable:$false] %s919_s25 }
  0x22   : > { %s921_s27 = scalar_lea.vmem %s920_s25, 128  ;;  %p922_p11 = scmp.lt.s32.totalorder %s1122_s14, %s920_s25 }
  0x23   : > { %p917_p4 = pnand %p915_p2, %p901_p3  ;;  %p923_p5 = scmp.lt.s32.totalorder %s921_s27, %s914_s23 }
  0x25   : > { %p918_p12 = pneg %p917_p4  ;;  %p924_p8 = por %p923_p5, %p922_p11 }
  0x27   : > { %p925_p9 = pnand %p924_p8, %p918_p12 }
  0x29   : > { %928 = shalt.err (!%p925_p9)
}
  0x2a   : > { %842 = dma.hbm_to_vmem [thread:$0]  (!%p1118_p13), %s1114_s28, 64, %s1122_s14, %s288_s17  }
  0x2b   : > { %p1295_p0 = scmp.lt.s32.totalorder %s995_s12, 3  ;;  %p1296_p1 = scmp.ge.s32.totalorder %s995_s12, 1 }
  0x2d   : > { %p304_p3 = pnand %p1296_p1, %p1295_p0 }
  0x2e   : > { %s1156_s24 = sand.u32 (!%p304_p3), 1, %s987_s10  }
  0x2f   : > { %307 = sbr.rel (%p304_p3) target bundleno = 1163 (0x48b), region = 56  ;;  %s761_s26 = sshll.u32 (!%p304_p3), %s1156_s24, 2 }
  0x30   : > { %s310_s29 = scalar_lea.sflag (!%p304_p3), [#allocation3], %s1156_s24  ;;  %s313_s23 = scalar_lea.vmem (!%p304_p3), [#allocation2], %s761_s26 }
  0x36   : > { %974 = dma.done.wait (%p1094_p6), %s310_s29, 64  }
  0x37   : > { %976 = vsyncadd (%p1094_p6), %s310_s29, 4294967232  ;;  %v998_v0 = vmov 0.0   ;;  %vm999_vm0 = vmmov 0   ;;  %v883_v1 = vld [vmem:[%s1280_s1] sm:$0xff]   ;;  %v884_v2 = vld [vmem:[%s1280_s1 + $0x8] sm:$0xff]   ;;  %vm373_vm1 = vcmask 261120  }
  0x38   : > { %799 = vmatprep.subr.bf16.mxu0 %v998_v0  ;;  %803 = vmatprep.mubr.msk.bf16.mxu0 %vm999_vm0, %v998_v0  ;;  %v349_v3 = vld [vmem:[%s313_s23] sm:$0xf]  ;;  %v886_v5 = vld [vmem:[%s1282_s3 + $0x8] sm:$0xff]   ;;  %v887_v6 = vld [vmem:[%s1282_s3 + $0x10] sm:$0xff]   ;;  %vm466_vm2 = vcmask 523264   ;;  %s762_s17 = sshll.u32 %s1156_s24, 3 }
  0x39   : > { %807 = vmatprep.subr.bf16.mxu1 %v998_v0  ;;  %815 = vmatprep.mubr.msk.bf16.mxu1 %vm999_vm0, %v998_v0  ;;  %v885_v4 = vld [vmem:[%s1282_s3] sm:$0xff]   ;;  %v888_v7 = vld [vmem:[%s1282_s3 + $0x18] sm:$0xff]   ;;  %v890_v34 = vld [vmem:[%s1284_s5 + $0x8] sm:$0xff]   ;;  %s782_s27 = sshll.u32 %s1072_s13, 7  ;;  %s347_s26 = scalar_lea.vmem [#allocation5], %s762_s17 }
  0x3a   : > { %800 = vmatpush3.bf16.msra.mxu0 %v883_v1  ;;  %808 = vmatpush3.bf16.msra.mxu1 %v885_v4  ;;  %v763_v8 = vld [vmem:[%s1281_s2] ss:$0 sm:$0xff]  ;;  %v892_v48 = vld [vmem:[%s1286_s7 + $0x8] sm:$0xff]   ;;  %s685_s29 = sshll.u32 %s347_s26, 4  ;;  %s1234_s14 = scalar_lea.hbm %s1288_s9, %s782_s27  ;;  %s1236_s29 = int_to_ptr.vmem [resolvable:$true] %s685_s29 }
  0x3b   : > { %801 = vmatprep.subr.bf16.mxu0 %v998_v0  ;;  %809 = vmatprep.subr.bf16.mxu1 %v998_v0  ;;  %v767_v24 = vld [vmem:[%s1283_s4] ss:$0 sm:$0xff]  ;;  %s672_s13 = scalar_lea.sflag [#allocation4], %s1156_s24  ;;  %s929_s16 = scalar_lea.vmem %s1236_s29, 128 }
  0x3c   : > { %v889_v33 = vld [vmem:[%s1284_s5] sm:$0xff]   ;;  %p930_p6 = scmp.ne.s32.totalorder %s1236_s29, %s929_s16  ;;  %p1297_p11 = scmp.ne.s32.totalorder %s1292_s21, 0 }
  0x3d   : > { %v891_v47 = vld [vmem:[%s1286_s7] sm:$0xff]   ;;  %s1000_s20 = smov [#allocation5]  }
  0x3e   : > { %802 = vmatpush3.bf16.msra.mxu0 %v884_v2  ;;  %810 = vmatpush3.bf16.msra.mxu1 %v886_v5  ;;  %v773_v49 = vld [vmem:[%s1285_s6] ss:$0 sm:$0xff]  ;;  %p931_p12 = pnand %p930_p6, %p1297_p11  ;;  %s933_s17 = sshll.u32 %s1000_s20, 4  ;;  %s934_s17 = int_to_ptr.vmem [resolvable:$false] %s933_s17 }
  0x3f   : > { %819 = vmatprep.subr.bf16.mxu0 %v998_v0  ;;  %811 = vmatprep.subr.bf16.mxu1 %v998_v0  ;;  %v777_v1 = vld [vmem:[%s1287_s8] ss:$0 sm:$0xff]  ;;  %s935_s19 = scalar_lea.vmem %s934_s17, 256  ;;  %p936_p7 = scmp.lt.s32.totalorder %s1236_s29, %s934_s17 }
  0x40   : > { %p932_p13 = pneg %p931_p12  ;;  %p937_p10 = scmp.lt.s32.totalorder %s935_s19, %s929_s16 }
  0x41   : > { %804 = vmatmul.mubr.msk.bf16.vlgmr.msra.gmra.mrb[0].mxu0 %vm373_vm1, %v349_v3 }
  0x42   : > { %823 = vmatprep.mubr.msk.bf16.mxu0 %vm999_vm0, %v998_v0  ;;  %812 = vmatpush3.bf16.msra.mxu1 %v887_v6  ;;  %p938_p2 = por %p937_p10, %p936_p7 }
  0x43   : > { %813 = vmatprep.subr.bf16.mxu1 %v998_v0  ;;  %820 = vmatpush3.bf16.msra.mxu0 %v889_v33 }
  0x44   : > { %821 = vmatprep.subr.bf16.mxu0 %v998_v0  ;;  %p939_p4 = pnand %p938_p2, %p932_p13 }
  0x46   : > { %814 = vmatpush3.bf16.msra.mxu1 %v888_v7 }
  0x47   : > { %822 = vmatpush3.bf16.msra.mxu0 %v890_v34 }
  0x48   : > { %827 = vmatprep.subr.bf16.mxu0 %v998_v0 }
 0x114   : > { %v411_v9 = vpop.f32.mrb[0].mxu0 }
 0x115   : > { %v412_v10 = vadd.f32 %v763_v8, %v411_v9  ;;  %v805_v11 = vpop.f32.mrb[1].mxu0 }
 0x116   : > { %v414_v12 = vpop.f32.mrb[2].mxu0 }
 0x117   : > { %v417_v13 = vmul.f32 %v412_v10, %v412_v10  ;;  %v806_v14 = vpop.f32.mrb[3].mxu0 }
 0x119   : > { %v418_v15 = vmul.f32 %v417_v13, %v412_v10 }
 0x11b   : > { %v419_v16 = vmul.f32 0.044715, %v418_v15 }
 0x11d   : > { %v420_v17 = vadd.f32 %v419_v16, %v412_v10 }
 0x11f   : > { %v421_v18 = vmul.f32 0.7978846, %v420_v17 }
 0x121   : > { %893 = vtanh.f32 %v421_v18 }
 0x12b   : > { %v894_v19 = vpop.eup %893 }
 0x12c   : > { %v423_v20 = vadd.f32 1.0, %v894_v19 }
 0x12e   : > { %v424_v21 = vmul.f32 0.5, %v423_v20 }
 0x130   : > { %v425_v22 = vmul.f32 %v424_v21, %v412_v10 }
 0x132   : > { %v426_v23 = vpack.c.bf16 %v425_v22, %v425_v22 }
 0x134   : > { %816 = vmatmul.mubr.msk.bf16.vlgmr.msra.gmra.mrb[0].mxu1 %vm466_vm2, %v426_v23 }
 0x207   : > { %v504_v25 = vpop.f32.mrb[0].mxu1 }
 0x208   : > { %v505_v26 = vadd.f32 %v767_v24, %v504_v25  ;;  %v817_v27 = vpop.f32.mrb[1].mxu1 }
 0x209   : > { %v507_v28 = vpop.f32.mrb[2].mxu1 }
 0x20a   : > { %v818_v29 = vpop.f32.mrb[3].mxu1  ;;  %v510_v30 = vsel %vm373_vm1, %v505_v26, 0.0  ;;  %v515_v31 = vmul.f32 %v505_v26, %v505_v26 }
 0x20b   : > { %511 = vadd.xlane.f32.xlu0 %v510_v30 }
 0x20c   : > { %v516_v32 = vsel %vm373_vm1, %v515_v31, 0.0 }
 0x20f   : > { %517 = vadd.xlane.f32.xlu0 %v516_v32 }
 0x298   : > { %v512_v35 = vpop.xlane.xlu0 %511 }
 0x299   : > { %v514_v36 = vmul.f32 0.03125, %v512_v35 }
 0x29b   : > { %v520_v38 = vmul.f32 %v514_v36, %v514_v36  ;;  %v525_v43 = vsub.f32 %v505_v26, %v514_v36 }
 0x29c   : > { %v518_v37 = vpop.xlane.xlu0 %517 }
 0x29d   : > { %v519_v39 = vmul.f32 0.03125, %v518_v37 }
 0x29f   : > { %v521_v40 = vsub.f32 %v519_v39, %v520_v38 }
 0x2a1   : > { %v522_v41 = vmax.f32 %v521_v40, 0.0 }
 0x2a3   : > { %v523_v42 = vadd.f32 1e-05, %v522_v41 }
 0x2a5   : > { %895 = vrsqrt.f32 %v523_v42 }
 0x2af   : > { %v896_v44 = vpop.eup %895 }
 0x2b0   : > { %v526_v45 = vmul.f32 %v896_v44, %v525_v43 }
 0x2b2   : > { %v527_v46 = vpack.c.bf16 %v526_v45, %v526_v45 }
 0x2b4   : > { %824 = vmatmul.mubr.msk.bf16.vlgmr.msra.gmra.mrb[4].mxu0 %vm373_vm1, %v527_v46 }
 0x2b5   : > { %831 = vmatprep.mubr.msk.bf16.mxu0 %vm999_vm0, %v998_v0  ;;  %828 = vmatpush3.bf16.msra.mxu0 %v891_v47 }
 0x2b6   : > { %829 = vmatprep.subr.bf16.mxu0 %v998_v0 }
 0x2b9   : > { %830 = vmatpush3.bf16.msra.mxu0 %v892_v48 }
 0x387   : > { %v588_v50 = vpop.f32.mrb[4].mxu0 }
 0x388   : > { %v589_v51 = vadd.f32 %v773_v49, %v588_v50  ;;  %v825_v52 = vpop.f32.mrb[5].mxu0 }
 0x389   : > { %v591_v53 = vpop.f32.mrb[6].mxu0 }
 0x38a   : > { %v594_v54 = vmul.f32 %v589_v51, %v589_v51  ;;  %v826_v55 = vpop.f32.mrb[7].mxu0 }
 0x38c   : > { %v595_v56 = vmul.f32 %v594_v54, %v589_v51 }
 0x38e   : > { %v596_v57 = vmul.f32 0.044715, %v595_v56 }
 0x390   : > { %v597_v58 = vadd.f32 %v596_v57, %v589_v51 }
 0x392   : > { %v598_v59 = vmul.f32 0.7978846, %v597_v58 }
 0x394   : > { %897 = vtanh.f32 %v598_v59 }
 0x39e   : > { %v898_v60 = vpop.eup %897 }
 0x39f   : > { %v600_v61 = vadd.f32 1.0, %v898_v60 }
 0x3a1   : > { %v601_v62 = vmul.f32 0.5, %v600_v61 }
 0x3a3   : > { %v602_v63 = vmul.f32 %v601_v62, %v589_v51 }
 0x3a5   : > { %v603_v0 = vpack.c.bf16 %v602_v63, %v602_v63 }
 0x3a7   : > { %832 = vmatmul.mubr.msk.bf16.vlgmr.msra.gmra.mrb[8].mxu0 %vm373_vm1, %v603_v0 }
 0x47a   : > { %v664_v2 = vpop.f32.mrb[8].mxu0 }
 0x47b   : > { %v665_v3 = vadd.f32 %v777_v1, %v664_v2  ;;  %v833_v4 = vpop.f32.mrb[9].mxu0 }
 0x47c   : > { %v667_v5 = vpop.f32.mrb[10].mxu0 }
 0x47d   : > { %v834_v6 = vpop.f32.mrb[11].mxu0  ;;  %670 = vst.msk [vmem:[%s347_s26] sm:$0xff] %vm373_vm1, %v665_v3 }
 0x47e   : > { %942 = shalt.err (!%p939_p4)
}
 0x47f   : > { %s943_s24 = scalar_lea.hbm %s1234_s14, 128  ;;  %s947_s26 = scalar_lea.hbm %s1288_s9, 256 }
 0x480   : > { %p944_p5 = scmp.ne.s32.totalorder %s1234_s14, %s943_s24  ;;  %p948_p0 = scmp.lt.u32.totalorder %s1234_s14, %s1288_s9 }
 0x481   : > { %p949_p1 = scmp.lt.u32.totalorder %s947_s26, %s943_s24  ;;  %p951_p6 = scmp.lt.u32.totalorder %s943_s24, %s1234_s14 }
 0x482   : > { %p945_p8 = pnand %p944_p5, %p1297_p11 }
 0x483   : > { %p950_p3 = por %p949_p1, %p948_p0 }
 0x484   : > { %p946_p9 = pneg %p945_p8 }
 0x485   : > { %p952_p12 = por %p951_p6, %p950_p3 }
 0x487   : > { %p953_p13 = pnand %p952_p12, %p946_p9 }
 0x489   : > { %956 = shalt.err (!%p953_p13)
}
 0x48a   : > { %837 = dma.vmem_to_hbm [thread:$0]  (%p1297_p11), %s1236_s29, 128, %s1234_s14, %s672_s13  }
 0x48b PF: > { %s697_s16 = sand.u32 1, %s983_s30   ;;  %p1298_p7 = scmp.ne.s32.totalorder %s1293_s22, 0 }
 0x48c   : > { %p1299_p10 = scmp.ge.s32.totalorder %s995_s12, 2  ;;  %s698_s20 = scalar_lea.sflag [#allocation4], %s697_s16 }
 0x48e   : > { %p844_p2 = pnand %p1299_p10, %p1298_p7 }
 0x490   : > { %978 = dma.done.wait (!%p844_p2), %s698_s20, 128  }
 0x491   : > { %980 = vsyncadd (!%p844_p2), %s698_s20, 4294967168  ;;  %p22_p4 = scmp.ge.s32.totalorder %s1076_s15, 4   ;;  %s1300_s30 = smov %s987_s10 }
 0x492   : > { %s1301_s10 = smov %s991_s11  ;;  %s1302_s11 = smov %s1088_s18 }
 0x493   : > { %s1303_s12 = smov %s1076_s15  ;;  %24 = sbr.rel (!%p22_p4) target bundleno = 5 (0x5), region = 101 }
 0x49a   :  { %703 = vsyncpa [#allocation3], 1 }
 0x49b   :  { %705 = vsyncpa [#allocation3 + $0x1], 1 }
 0x49c   :  { %706 = vsyncpa [#allocation4], 1 }
 0x49d   :  { %708 = vsyncpa [#allocation4 + $0x1], 1 }

</bundles_post_ra>
